<compile_context>
chip_gen: v5e
topology: v5e:2x2
jax: 0.10.0
libtpu: 0.0.40
codegen_flags: <defaults>
</compile_context>

<pallas_src>
import functools

import jax
import jax.numpy as jnp
import numpy as np
from jax.experimental import pallas as pl
from jax.experimental.pallas import tpu as pltpu


# ----------------------------- Pallas kernel ------------------------------ #
def _realnvp_kernel(*refs, fuse_st):
    """Full L-layer RealNVP forward on one (TB, D) batch tile.

    refs layout (inputs..., outputs...):
      fuse_st=True : x, masks, w1, b1, w2, b2, w3s, b3s, w3t, b3t, z, logdet
      fuse_st=False: x, masks, w1, b1, w2s, b2s, w2t, b2t, w3s, b3s, w3t, b3t,
                     z, logdet
    """
    if fuse_st:
        (x_ref, m_ref, w1_ref, b1_ref, w2_ref, b2_ref,
         w3s_ref, b3s_ref, w3t_ref, b3t_ref, z_ref, ld_ref) = refs
    else:
        (x_ref, m_ref, w1_ref, b1_ref, w2s_ref, b2s_ref, w2t_ref, b2t_ref,
         w3s_ref, b3s_ref, w3t_ref, b3t_ref, z_ref, ld_ref) = refs

    num_layers = m_ref.shape[0]
    hidden = w1_ref.shape[-1] // 2
    mxu_dtype = w1_ref.dtype            # bf16 weights -> bf16 MXU operands

    x = x_ref[...]                      # (TB, D) f32; stays on-chip all layers
    tb, d = x.shape
    ld = jnp.zeros((tb, 1), jnp.float32)

    for l in range(num_layers):         # static unroll; L is small
        # Hoist the mask broadcast once per layer (JAX does not CSE
        # broadcast_in_dim; it is reused three times below).
        mb = jnp.broadcast_to(m_ref[l], (tb, d))
        omb = 1.0 - mb

        xm = (x * mb).astype(mxu_dtype)

        # Layer 1: shared s/t input -> one fused (D, 2H) matmul (exact concat).
        h = jnp.dot(xm, w1_ref[l], preferred_element_type=jnp.float32) + b1_ref[l]
        h = jnp.maximum(h, 0.0)

        if fuse_st:
            # 2H <= MXU width: block-diag (2H,2H) layer-2 is free MXU padding;
            # layer 3 is two (2H,D) dots so s/t never needs a mid-lane slice.
            hb = h.astype(mxu_dtype)
            h2 = jnp.dot(hb, w2_ref[l], preferred_element_type=jnp.float32) + b2_ref[l]
            h2 = jnp.maximum(h2, 0.0).astype(mxu_dtype)
            s = jnp.dot(h2, w3s_ref[l], preferred_element_type=jnp.float32) + b3s_ref[l]
            t = jnp.dot(h2, w3t_ref[l], preferred_element_type=jnp.float32) + b3t_ref[l]
        else:
            # 2H > MXU width: drop the zero blocks; run s/t layers 2/3 as
            # separate matmuls (the h split at lane H is aligned once H is a
            # multiple of the lane width at scaled configs).
            hs = h[:, :hidden].astype(mxu_dtype)
            ht = h[:, hidden:].astype(mxu_dtype)
            hs = jnp.maximum(
                jnp.dot(hs, w2s_ref[l], preferred_element_type=jnp.float32)
                + b2s_ref[l], 0.0).astype(mxu_dtype)
            ht = jnp.maximum(
                jnp.dot(ht, w2t_ref[l], preferred_element_type=jnp.float32)
                + b2t_ref[l], 0.0).astype(mxu_dtype)
            s = jnp.dot(hs, w3s_ref[l], preferred_element_type=jnp.float32) + b3s_ref[l]
            t = jnp.dot(ht, w3t_ref[l], preferred_element_type=jnp.float32) + b3t_ref[l]

        # Affine coupling (exp -> EUP slot) + logdet reduce (XLU slot), in f32.
        x = x * mb + omb * (x * jnp.exp(s) + t)
        ld = ld + jnp.sum(omb * s, axis=1, keepdims=True)

    z_ref[...] = x
    ld_ref[...] = ld


# ------------------------------- Wrapper ----------------------------------- #
def _round_up(n, m):
    return ((n + m - 1) // m) * m


def _pick_batch_tile(batch):
    """TB is always a multiple of 8; ragged batches are padded by the caller.

    * tiny batches       -> one whole-batch tile
    * moderate batches   -> ~B/2 rows => >= 2 grid steps (both v7x TensorCores)
    * large batches      -> 1024-row tiles (amortize ~0.35us/step overhead,
                            bounded VMEM working set, still many parallel steps)
    """
    b8 = _round_up(batch, 8)
    if b8 <= 16:
        return b8
    if b8 <= 2048:
        return _round_up(pl.cdiv(b8, 2), 8)
    return 1024


def _const_spec(a):
    nd = a.ndim
    return pl.BlockSpec(a.shape, lambda i, _nd=nd: (0,) * _nd)


@functools.partial(jax.jit, static_argnames=("fuse_st",))
def realnvp_forward(x, params, *, fuse_st):
    """Fused RealNVP forward. Returns (z, logdet) with z:(B,D), logdet:(B,)."""
    B, D = x.shape
    TB = _pick_batch_tile(B)
    n_tiles = pl.cdiv(B, TB)
    B_pad = n_tiles * TB
    x_p = x if B_pad == B else jnp.pad(x, ((0, B_pad - B), (0, 0)))

    if fuse_st:
        names = ("masks", "w1", "b1", "w2", "b2", "w3s", "b3s", "w3t", "b3t")
    else:
        names = ("masks", "w1", "b1", "w2s", "b2s", "w2t", "b2t",
                 "w3s", "b3s", "w3t", "b3t")
    weight_args = [params[n] for n in names]

    in_specs = ([pl.BlockSpec((TB, D), lambda i: (i, 0))]
                + [_const_spec(a) for a in weight_args])
    out_specs = (pl.BlockSpec((TB, D), lambda i: (i, 0)),     # z
                 pl.BlockSpec((TB, 1), lambda i: (i, 0)))     # logdet

    L = params["masks"].shape[0]
    H = params["w1"].shape[-1] // 2
    if fuse_st:
        per_row = 2 * (D * 2 * H + (2 * H) * (2 * H) + 2 * (2 * H) * D)
    else:
        per_row = 2 * (D * 2 * H + 2 * H * H + 2 * H * D)
    weight_bytes = sum(int(a.size) * a.dtype.itemsize for a in weight_args)
    cost = pl.CostEstimate(
        flops=int(B_pad * L * per_row),
        transcendentals=int(B_pad * L * D),
        bytes_accessed=int(2 * B_pad * D * 4 + B_pad * 4 + weight_bytes))

    # Pipeline double-buffers every input (even constant-index weights) plus
    # the x/z tiles; only raise the scoped VMEM limit when we actually need it.
    act_bytes = TB * (2 * D + 8 * H) * 4
    vmem_est = 2 * weight_bytes + 2 * 2 * (TB * D * 4 + TB * 4) + 2 * act_bytes
    vmem_limit = int(min(60 * 2**20, 2 * vmem_est)) if vmem_est > 16 * 2**20 else None

    kernel = functools.partial(_realnvp_kernel, fuse_st=fuse_st)
    z, ld = pl.pallas_call(
        kernel,
        out_shape=(jax.ShapeDtypeStruct((B_pad, D), jnp.float32),
                   jax.ShapeDtypeStruct((B_pad, 1), jnp.float32)),
        grid_spec=pl.GridSpec(grid=(n_tiles,), in_specs=in_specs,
                              out_specs=out_specs),
        compiler_params=pltpu.CompilerParams(
            dimension_semantics=("parallel",),
            vmem_limit_bytes=vmem_limit),
        cost_estimate=cost,
    )(x_p, *weight_args)
    return z[:B], ld[:B, 0]


# ------------------------------ Model setup -------------------------------- #
def create_checkerboard_mask_2d(input_dim, invert=False):
    mask = (jnp.arange(input_dim) % 2).astype(jnp.float32)
    if invert:
        mask = 1.0 - mask
    return mask


def _init_linear(key, in_dim, out_dim):
    """nn.Linear default init U(-1/sqrt(in), 1/sqrt(in)); weight pre-transposed
    to (in, out), bias (1, out)."""
    kw, kb = jax.random.split(key)
    bound = 1.0 / np.sqrt(in_dim)
    w = jax.random.uniform(kw, (in_dim, out_dim), jnp.float32, -bound, bound)
    b = jax.random.uniform(kb, (1, out_dim), jnp.float32, -bound, bound)
    return w, b


def init_realnvp_params(key, input_dim, hidden_dim, num_layers, *,
                        weight_dtype=jnp.bfloat16, mxu_width=256):
    """Returns (stacked kernel params dict, raw per-layer params for the pure-JAX
    reference, fuse_st flag)."""
    D, H = input_dim, hidden_dim
    fuse_st = (2 * H) <= mxu_width
    zHH = jnp.zeros((H, H), jnp.float32)
    zHD = jnp.zeros((H, D), jnp.float32)

    raw_layers, layer_packs = [], []
    for i in range(num_layers):
        key, *ks = jax.random.split(key, 7)
        s_w1, s_b1 = _init_linear(ks[0], D, H)
        s_w2, s_b2 = _init_linear(ks[1], H, H)
        s_w3, s_b3 = _init_linear(ks[2], H, D)
        t_w1, t_b1 = _init_linear(ks[3], D, H)
        t_w2, t_b2 = _init_linear(ks[4], H, H)
        t_w3, t_b3 = _init_linear(ks[5], H, D)
        mask = create_checkerboard_mask_2d(D, invert=(i % 2 == 0)).reshape(1, D)

        raw_layers.append({
            "mask": mask,
            "params": (s_w1, s_b1, s_w2, s_b2, s_w3, s_b3,
                       t_w1, t_b1, t_w2, t_b2, t_w3, t_b3),
        })

        pack = {
            "masks": mask,
            "w1": jnp.concatenate([s_w1, t_w1], axis=1),          # (D, 2H)
            "b1": jnp.concatenate([s_b1, t_b1], axis=1),          # (1, 2H)
            "b3s": s_b3, "b3t": t_b3,                              # (1, D)
        }
        if fuse_st:
            pack["w2"] = jnp.concatenate(
                [jnp.concatenate([s_w2, zHH], axis=1),
                 jnp.concatenate([zHH, t_w2], axis=1)], axis=0)    # (2H, 2H)
            pack["b2"] = jnp.concatenate([s_b2, t_b2], axis=1)     # (1, 2H)
            pack["w3s"] = jnp.concatenate([s_w3, zHD], axis=0)     # (2H, D)
            pack["w3t"] = jnp.concatenate([zHD, t_w3], axis=0)     # (2H, D)
        else:
            pack["w2s"], pack["b2s"] = s_w2, s_b2                  # (H, H)/(1, H)
            pack["w2t"], pack["b2t"] = t_w2, t_b2
            pack["w3s"], pack["w3t"] = s_w3, t_w3                  # (H, D)
        layer_packs.append(pack)

    stacked = {}
    for k in layer_packs[0]:
        arr = jnp.stack([p[k] for p in layer_packs])
        if k.startswith("w"):
            arr = arr.astype(weight_dtype)   # MXU operands; biases/masks stay f32
        stacked[k] = arr
    return stacked, raw_layers, fuse_st


# Pure-JAX reference (mirrors the PyTorch module; dot_dtype mirrors the MXU
# operand precision used by the kernel).
def _realnvp_forward_ref(raw_layers, x, *, dot_dtype=jnp.float32):
    def dot(a, b):
        return jnp.dot(a.astype(dot_dtype), b.astype(dot_dtype),
                       preferred_element_type=jnp.float32)

    logdet = jnp.zeros((x.shape[0],), jnp.float32)
    for layer in raw_layers:
        m = layer["mask"]
        (sw1, sb1, sw2, sb2, sw3, sb3,
         tw1, tb1, tw2, tb2, tw3, tb3) = layer["params"]
        xm = x * m
        s = jnp.maximum(dot(xm, sw1) + sb1, 0.0)
        s = jnp.maximum(dot(s, sw2) + sb2, 0.0)
        s = dot(s, sw3) + sb3
        t = jnp.maximum(dot(xm, tw1) + tb1, 0.0)
        t = jnp.maximum(dot(t, tw2) + tb2, 0.0)
        t = dot(t, tw3) + tb3
        x = x * m + (1.0 - m) * (x * jnp.exp(s) + t)
        logdet = logdet + jnp.sum((1.0 - m) * s, axis=1)
    return x, logdet


def _check(z, ld, z_ref, ld_ref, rtol, atol):
    np.testing.assert_allclose(np.asarray(z), np.asarray(z_ref), rtol=rtol, atol=atol)
    np.testing.assert_allclose(np.asarray(ld), np.asarray(ld_ref), rtol=rtol, atol=atol)


if __name__ == "__main__":
    key = jax.random.PRNGKey(0)
    k1, kx1, k2, kx2, k3, kx3 = jax.random.split(key, 6)

    # --- Config 1: small H -> fused block-diag s/t path, bf16 MXU weights ----
    D, H, L, B = 16, 32, 4, 8
    params, raw, fuse = init_realnvp_params(k1, D, H, L)           # fuse_st=True
    x = jax.random.normal(kx1, (B, D), jnp.float32)
    z, ld = realnvp_forward(x, params, fuse_st=fuse)
    jax.block_until_ready(z); jax.block_until_ready(ld)
    z_ref, ld_ref = _realnvp_forward_ref(raw, x, dot_dtype=jnp.bfloat16)
    _check(z, ld, z_ref, ld_ref, rtol=1e-4, atol=1e-4)

    # --- Config 2: large H -> split s/t path, ragged batch (padding, 2 tiles) -
    D2, H2, L2, B2 = 16, 256, 2, 20
    params2, raw2, fuse2 = init_realnvp_params(k2, D2, H2, L2)     # fuse_st=False
    x2 = jax.random.normal(kx2, (B2, D2), jnp.float32)
    z2, ld2 = realnvp_forward(x2, params2, fuse_st=fuse2)
    jax.block_until_ready(z2); jax.block_until_ready(ld2)
    z2_ref, ld2_ref = _realnvp_forward_ref(raw2, x2, dot_dtype=jnp.bfloat16)
    _check(z2, ld2, z2_ref, ld2_ref, rtol=1e-4, atol=1e-4)

    # --- Config 3: f32 weights -> exact check vs. the PyTorch-style reference -
    params3, raw3, fuse3 = init_realnvp_params(k3, D, H, L, weight_dtype=jnp.float32)
    x3 = jax.random.normal(kx3, (B, D), jnp.float32)
    z3, ld3 = realnvp_forward(x3, params3, fuse_st=fuse3)
    jax.block_until_ready(z3); jax.block_until_ready(ld3)
    z3_ref, ld3_ref = _realnvp_forward_ref(raw3, x3)               # pure f32
    _check(z3, ld3, z3_ref, ld3_ref, rtol=1e-5, atol=1e-5)

    print("KERNEL_OK")
</pallas_src>

<mosaic_0001>
module attributes {stable_mosaic.version = 11 : i64} {
  func.func @_realnvp_kernel(%arg0: i32, %arg1: memref<8x16xf32, #tpu.memory_space<vmem>>, %arg2: memref<4x1x16xf32, #tpu.memory_space<vmem>>, %arg3: memref<4x16x64xbf16, #tpu.memory_space<vmem>>, %arg4: memref<4x1x64xf32, #tpu.memory_space<vmem>>, %arg5: memref<4x64x64xbf16, #tpu.memory_space<vmem>>, %arg6: memref<4x1x64xf32, #tpu.memory_space<vmem>>, %arg7: memref<4x64x16xbf16, #tpu.memory_space<vmem>>, %arg8: memref<4x1x16xf32, #tpu.memory_space<vmem>>, %arg9: memref<4x64x16xbf16, #tpu.memory_space<vmem>>, %arg10: memref<4x1x16xf32, #tpu.memory_space<vmem>>, %arg11: memref<8x16xf32, #tpu.memory_space<vmem>>, %arg12: memref<8x1xf32, #tpu.memory_space<vmem>>) attributes {dimension_semantics = [#tpu.dimension_semantics<parallel>], iteration_bounds = array<i64: 1>, scalar_prefetch = 0 : i64, scratch_operands = 0 : i64, tpu.core_type = #tpu.core_type<tc>, window_params = [{transform_indices = @transform_0, window_bounds = array<i64: 8, 16>}, {pipeline_mode = #tpu.pipeline_mode<synchronous>, transform_indices = @transform_1, window_bounds = array<i64: 4, 1, 16>}, {pipeline_mode = #tpu.pipeline_mode<synchronous>, transform_indices = @transform_2, window_bounds = array<i64: 4, 16, 64>}, {pipeline_mode = #tpu.pipeline_mode<synchronous>, transform_indices = @transform_3, window_bounds = array<i64: 4, 1, 64>}, {pipeline_mode = #tpu.pipeline_mode<synchronous>, transform_indices = @transform_4, window_bounds = array<i64: 4, 64, 64>}, {pipeline_mode = #tpu.pipeline_mode<synchronous>, transform_indices = @transform_5, window_bounds = array<i64: 4, 1, 64>}, {pipeline_mode = #tpu.pipeline_mode<synchronous>, transform_indices = @transform_6, window_bounds = array<i64: 4, 64, 16>}, {pipeline_mode = #tpu.pipeline_mode<synchronous>, transform_indices = @transform_7, window_bounds = array<i64: 4, 1, 16>}, {pipeline_mode = #tpu.pipeline_mode<synchronous>, transform_indices = @transform_8, window_bounds = array<i64: 4, 64, 16>}, {pipeline_mode = #tpu.pipeline_mode<synchronous>, transform_indices = @transform_9, window_bounds = array<i64: 4, 1, 16>}, {transform_indices = @transform_10, window_bounds = array<i64: 8, 16>}, {transform_indices = @transform_11, window_bounds = array<i64: 8, 1>}]} {
    %c0 = arith.constant 0 : index
    %c0_0 = arith.constant 0 : index
    %0 = vector.load %arg1[%c0, %c0_0] : memref<8x16xf32, #tpu.memory_space<vmem>>, vector<8x16xf32>
    %cst = arith.constant 0.000000e+00 : f32
    %1 = vector.broadcast %cst : f32 to vector<8x1xf32>
    %c0_1 = arith.constant 0 : index
    %c0_2 = arith.constant 0 : index
    %c0_3 = arith.constant 0 : index
    %2 = vector.load %arg2[%c0_1, %c0_2, %c0_3] : memref<4x1x16xf32, #tpu.memory_space<vmem>>, vector<1x1x16xf32>
    %3 = vector.shape_cast %2 : vector<1x1x16xf32> to vector<1x16xf32>
    %4 = vector.shape_cast %3 : vector<1x16xf32> to vector<1x16xf32>
    %5 = vector.broadcast %4 : vector<1x16xf32> to vector<8x16xf32>
    %cst_4 = arith.constant 1.000000e+00 : f32
    %6 = vector.broadcast %cst_4 : f32 to vector<8x16xf32>
    %7 = arith.subf %6, %5 : vector<8x16xf32>
    %8 = arith.mulf %0, %5 : vector<8x16xf32>
    %9 = arith.truncf %8 : vector<8x16xf32> to vector<8x16xbf16>
    %c0_5 = arith.constant 0 : index
    %c0_6 = arith.constant 0 : index
    %c0_7 = arith.constant 0 : index
    %10 = vector.load %arg3[%c0_5, %c0_6, %c0_7] : memref<4x16x64xbf16, #tpu.memory_space<vmem>>, vector<1x16x64xbf16>
    %11 = vector.shape_cast %10 : vector<1x16x64xbf16> to vector<16x64xbf16>
    %cst_8 = arith.constant dense<0.000000e+00> : vector<8x64xf32>
    %12 = tpu.matmul %9, %11, %cst_8 {dimension_numbers = #tpu.dot_dimension_numbers<[1], [0], [0], [1], [0, 0, 1, 1], [], []>} : vector<8x16xbf16>, vector<16x64xbf16>, vector<8x64xf32> -> vector<8x64xf32>
    %c0_9 = arith.constant 0 : index
    %c0_10 = arith.constant 0 : index
    %c0_11 = arith.constant 0 : index
    %13 = vector.load %arg4[%c0_9, %c0_10, %c0_11] : memref<4x1x64xf32, #tpu.memory_space<vmem>>, vector<1x1x64xf32>
    %14 = vector.shape_cast %13 : vector<1x1x64xf32> to vector<1x64xf32>
    %15 = vector.broadcast %14 : vector<1x64xf32> to vector<8x64xf32>
    %16 = arith.addf %12, %15 : vector<8x64xf32>
    %cst_12 = arith.constant 0.000000e+00 : f32
    %17 = vector.broadcast %cst_12 : f32 to vector<8x64xf32>
    %18 = arith.maximumf %16, %17 : vector<8x64xf32>
    %19 = arith.truncf %18 : vector<8x64xf32> to vector<8x64xbf16>
    %c0_13 = arith.constant 0 : index
    %c0_14 = arith.constant 0 : index
    %c0_15 = arith.constant 0 : index
    %20 = vector.load %arg5[%c0_13, %c0_14, %c0_15] : memref<4x64x64xbf16, #tpu.memory_space<vmem>>, vector<1x64x64xbf16>
    %21 = vector.shape_cast %20 : vector<1x64x64xbf16> to vector<64x64xbf16>
    %cst_16 = arith.constant dense<0.000000e+00> : vector<8x64xf32>
    %22 = tpu.matmul %19, %21, %cst_16 {dimension_numbers = #tpu.dot_dimension_numbers<[1], [0], [0], [1], [0, 0, 1, 1], [], []>} : vector<8x64xbf16>, vector<64x64xbf16>, vector<8x64xf32> -> vector<8x64xf32>
    %c0_17 = arith.constant 0 : index
    %c0_18 = arith.constant 0 : index
    %c0_19 = arith.constant 0 : index
    %23 = vector.load %arg6[%c0_17, %c0_18, %c0_19] : memref<4x1x64xf32, #tpu.memory_space<vmem>>, vector<1x1x64xf32>
    %24 = vector.shape_cast %23 : vector<1x1x64xf32> to vector<1x64xf32>
    %25 = vector.broadcast %24 : vector<1x64xf32> to vector<8x64xf32>
    %26 = arith.addf %22, %25 : vector<8x64xf32>
    %cst_20 = arith.constant 0.000000e+00 : f32
    %27 = vector.broadcast %cst_20 : f32 to vector<8x64xf32>
    %28 = arith.maximumf %26, %27 : vector<8x64xf32>
    %29 = arith.truncf %28 : vector<8x64xf32> to vector<8x64xbf16>
    %c0_21 = arith.constant 0 : index
    %c0_22 = arith.constant 0 : index
    %c0_23 = arith.constant 0 : index
    %30 = vector.load %arg7[%c0_21, %c0_22, %c0_23] : memref<4x64x16xbf16, #tpu.memory_space<vmem>>, vector<1x64x16xbf16>
    %31 = vector.shape_cast %30 : vector<1x64x16xbf16> to vector<64x16xbf16>
    %cst_24 = arith.constant dense<0.000000e+00> : vector<8x16xf32>
    %32 = tpu.matmul %29, %31, %cst_24 {dimension_numbers = #tpu.dot_dimension_numbers<[1], [0], [0], [1], [0, 0, 1, 1], [], []>} : vector<8x64xbf16>, vector<64x16xbf16>, vector<8x16xf32> -> vector<8x16xf32>
    %c0_25 = arith.constant 0 : index
    %c0_26 = arith.constant 0 : index
    %c0_27 = arith.constant 0 : index
    %33 = vector.load %arg8[%c0_25, %c0_26, %c0_27] : memref<4x1x16xf32, #tpu.memory_space<vmem>>, vector<1x1x16xf32>
    %34 = vector.shape_cast %33 : vector<1x1x16xf32> to vector<1x16xf32>
    %35 = vector.broadcast %34 : vector<1x16xf32> to vector<8x16xf32>
    %36 = arith.addf %32, %35 : vector<8x16xf32>
    %c0_28 = arith.constant 0 : index
    %c0_29 = arith.constant 0 : index
    %c0_30 = arith.constant 0 : index
    %37 = vector.load %arg9[%c0_28, %c0_29, %c0_30] : memref<4x64x16xbf16, #tpu.memory_space<vmem>>, vector<1x64x16xbf16>
    %38 = vector.shape_cast %37 : vector<1x64x16xbf16> to vector<64x16xbf16>
    %cst_31 = arith.constant dense<0.000000e+00> : vector<8x16xf32>
    %39 = tpu.matmul %29, %38, %cst_31 {dimension_numbers = #tpu.dot_dimension_numbers<[1], [0], [0], [1], [0, 0, 1, 1], [], []>} : vector<8x64xbf16>, vector<64x16xbf16>, vector<8x16xf32> -> vector<8x16xf32>
    %c0_32 = arith.constant 0 : index
    %c0_33 = arith.constant 0 : index
    %c0_34 = arith.constant 0 : index
    %40 = vector.load %arg10[%c0_32, %c0_33, %c0_34] : memref<4x1x16xf32, #tpu.memory_space<vmem>>, vector<1x1x16xf32>
    %41 = vector.shape_cast %40 : vector<1x1x16xf32> to vector<1x16xf32>
    %42 = vector.broadcast %41 : vector<1x16xf32> to vector<8x16xf32>
    %43 = arith.addf %39, %42 : vector<8x16xf32>
    %44 = arith.mulf %0, %5 : vector<8x16xf32>
    %45 = math.exp %36 : vector<8x16xf32>
    %46 = arith.mulf %0, %45 : vector<8x16xf32>
    %47 = arith.addf %46, %43 : vector<8x16xf32>
    %48 = arith.mulf %7, %47 : vector<8x16xf32>
    %49 = arith.addf %44, %48 : vector<8x16xf32>
    %50 = arith.mulf %7, %36 : vector<8x16xf32>
    %cst_35 = arith.constant dense<0.000000e+00> : vector<8xf32>
    %51 = vector.multi_reduction <add>, %50, %cst_35 [1] : vector<8x16xf32> to vector<8xf32>
    %52 = vector.shape_cast %51 : vector<8xf32> to vector<8x1xf32>
    %53 = arith.addf %1, %52 : vector<8x1xf32>
    %c1 = arith.constant 1 : index
    %c0_36 = arith.constant 0 : index
    %c0_37 = arith.constant 0 : index
    %54 = vector.load %arg2[%c1, %c0_36, %c0_37] : memref<4x1x16xf32, #tpu.memory_space<vmem>>, vector<1x1x16xf32>
    %55 = vector.shape_cast %54 : vector<1x1x16xf32> to vector<1x16xf32>
    %56 = vector.shape_cast %55 : vector<1x16xf32> to vector<1x16xf32>
    %57 = vector.broadcast %56 : vector<1x16xf32> to vector<8x16xf32>
    %cst_38 = arith.constant 1.000000e+00 : f32
    %58 = vector.broadcast %cst_38 : f32 to vector<8x16xf32>
    %59 = arith.subf %58, %57 : vector<8x16xf32>
    %60 = arith.mulf %49, %57 : vector<8x16xf32>
    %61 = arith.truncf %60 : vector<8x16xf32> to vector<8x16xbf16>
    %c1_39 = arith.constant 1 : index
    %c0_40 = arith.constant 0 : index
    %c0_41 = arith.constant 0 : index
    %62 = vector.load %arg3[%c1_39, %c0_40, %c0_41] : memref<4x16x64xbf16, #tpu.memory_space<vmem>>, vector<1x16x64xbf16>
    %63 = vector.shape_cast %62 : vector<1x16x64xbf16> to vector<16x64xbf16>
    %cst_42 = arith.constant dense<0.000000e+00> : vector<8x64xf32>
    %64 = tpu.matmul %61, %63, %cst_42 {dimension_numbers = #tpu.dot_dimension_numbers<[1], [0], [0], [1], [0, 0, 1, 1], [], []>} : vector<8x16xbf16>, vector<16x64xbf16>, vector<8x64xf32> -> vector<8x64xf32>
    %c1_43 = arith.constant 1 : index
    %c0_44 = arith.constant 0 : index
    %c0_45 = arith.constant 0 : index
    %65 = vector.load %arg4[%c1_43, %c0_44, %c0_45] : memref<4x1x64xf32, #tpu.memory_space<vmem>>, vector<1x1x64xf32>
    %66 = vector.shape_cast %65 : vector<1x1x64xf32> to vector<1x64xf32>
    %67 = vector.broadcast %66 : vector<1x64xf32> to vector<8x64xf32>
    %68 = arith.addf %64, %67 : vector<8x64xf32>
    %cst_46 = arith.constant 0.000000e+00 : f32
    %69 = vector.broadcast %cst_46 : f32 to vector<8x64xf32>
    %70 = arith.maximumf %68, %69 : vector<8x64xf32>
    %71 = arith.truncf %70 : vector<8x64xf32> to vector<8x64xbf16>
    %c1_47 = arith.constant 1 : index
    %c0_48 = arith.constant 0 : index
    %c0_49 = arith.constant 0 : index
    %72 = vector.load %arg5[%c1_47, %c0_48, %c0_49] : memref<4x64x64xbf16, #tpu.memory_space<vmem>>, vector<1x64x64xbf16>
    %73 = vector.shape_cast %72 : vector<1x64x64xbf16> to vector<64x64xbf16>
    %cst_50 = arith.constant dense<0.000000e+00> : vector<8x64xf32>
    %74 = tpu.matmul %71, %73, %cst_50 {dimension_numbers = #tpu.dot_dimension_numbers<[1], [0], [0], [1], [0, 0, 1, 1], [], []>} : vector<8x64xbf16>, vector<64x64xbf16>, vector<8x64xf32> -> vector<8x64xf32>
    %c1_51 = arith.constant 1 : index
    %c0_52 = arith.constant 0 : index
    %c0_53 = arith.constant 0 : index
    %75 = vector.load %arg6[%c1_51, %c0_52, %c0_53] : memref<4x1x64xf32, #tpu.memory_space<vmem>>, vector<1x1x64xf32>
    %76 = vector.shape_cast %75 : vector<1x1x64xf32> to vector<1x64xf32>
    %77 = vector.broadcast %76 : vector<1x64xf32> to vector<8x64xf32>
    %78 = arith.addf %74, %77 : vector<8x64xf32>
    %cst_54 = arith.constant 0.000000e+00 : f32
    %79 = vector.broadcast %cst_54 : f32 to vector<8x64xf32>
    %80 = arith.maximumf %78, %79 : vector<8x64xf32>
    %81 = arith.truncf %80 : vector<8x64xf32> to vector<8x64xbf16>
    %c1_55 = arith.constant 1 : index
    %c0_56 = arith.constant 0 : index
    %c0_57 = arith.constant 0 : index
    %82 = vector.load %arg7[%c1_55, %c0_56, %c0_57] : memref<4x64x16xbf16, #tpu.memory_space<vmem>>, vector<1x64x16xbf16>
    %83 = vector.shape_cast %82 : vector<1x64x16xbf16> to vector<64x16xbf16>
    %cst_58 = arith.constant dense<0.000000e+00> : vector<8x16xf32>
    %84 = tpu.matmul %81, %83, %cst_58 {dimension_numbers = #tpu.dot_dimension_numbers<[1], [0], [0], [1], [0, 0, 1, 1], [], []>} : vector<8x64xbf16>, vector<64x16xbf16>, vector<8x16xf32> -> vector<8x16xf32>
    %c1_59 = arith.constant 1 : index
    %c0_60 = arith.constant 0 : index
    %c0_61 = arith.constant 0 : index
    %85 = vector.load %arg8[%c1_59, %c0_60, %c0_61] : memref<4x1x16xf32, #tpu.memory_space<vmem>>, vector<1x1x16xf32>
    %86 = vector.shape_cast %85 : vector<1x1x16xf32> to vector<1x16xf32>
    %87 = vector.broadcast %86 : vector<1x16xf32> to vector<8x16xf32>
    %88 = arith.addf %84, %87 : vector<8x16xf32>
    %c1_62 = arith.constant 1 : index
    %c0_63 = arith.constant 0 : index
    %c0_64 = arith.constant 0 : index
    %89 = vector.load %arg9[%c1_62, %c0_63, %c0_64] : memref<4x64x16xbf16, #tpu.memory_space<vmem>>, vector<1x64x16xbf16>
    %90 = vector.shape_cast %89 : vector<1x64x16xbf16> to vector<64x16xbf16>
    %cst_65 = arith.constant dense<0.000000e+00> : vector<8x16xf32>
    %91 = tpu.matmul %81, %90, %cst_65 {dimension_numbers = #tpu.dot_dimension_numbers<[1], [0], [0], [1], [0, 0, 1, 1], [], []>} : vector<8x64xbf16>, vector<64x16xbf16>, vector<8x16xf32> -> vector<8x16xf32>
    %c1_66 = arith.constant 1 : index
    %c0_67 = arith.constant 0 : index
    %c0_68 = arith.constant 0 : index
    %92 = vector.load %arg10[%c1_66, %c0_67, %c0_68] : memref<4x1x16xf32, #tpu.memory_space<vmem>>, vector<1x1x16xf32>
    %93 = vector.shape_cast %92 : vector<1x1x16xf32> to vector<1x16xf32>
    %94 = vector.broadcast %93 : vector<1x16xf32> to vector<8x16xf32>
    %95 = arith.addf %91, %94 : vector<8x16xf32>
    %96 = arith.mulf %49, %57 : vector<8x16xf32>
    %97 = math.exp %88 : vector<8x16xf32>
    %98 = arith.mulf %49, %97 : vector<8x16xf32>
    %99 = arith.addf %98, %95 : vector<8x16xf32>
    %100 = arith.mulf %59, %99 : vector<8x16xf32>
    %101 = arith.addf %96, %100 : vector<8x16xf32>
    %102 = arith.mulf %59, %88 : vector<8x16xf32>
    %cst_69 = arith.constant dense<0.000000e+00> : vector<8xf32>
    %103 = vector.multi_reduction <add>, %102, %cst_69 [1] : vector<8x16xf32> to vector<8xf32>
    %104 = vector.shape_cast %103 : vector<8xf32> to vector<8x1xf32>
    %105 = arith.addf %53, %104 : vector<8x1xf32>
    %c2 = arith.constant 2 : index
    %c0_70 = arith.constant 0 : index
    %c0_71 = arith.constant 0 : index
    %106 = vector.load %arg2[%c2, %c0_70, %c0_71] : memref<4x1x16xf32, #tpu.memory_space<vmem>>, vector<1x1x16xf32>
    %107 = vector.shape_cast %106 : vector<1x1x16xf32> to vector<1x16xf32>
    %108 = vector.shape_cast %107 : vector<1x16xf32> to vector<1x16xf32>
    %109 = vector.broadcast %108 : vector<1x16xf32> to vector<8x16xf32>
    %cst_72 = arith.constant 1.000000e+00 : f32
    %110 = vector.broadcast %cst_72 : f32 to vector<8x16xf32>
    %111 = arith.subf %110, %109 : vector<8x16xf32>
    %112 = arith.mulf %101, %109 : vector<8x16xf32>
    %113 = arith.truncf %112 : vector<8x16xf32> to vector<8x16xbf16>
    %c2_73 = arith.constant 2 : index
    %c0_74 = arith.constant 0 : index
    %c0_75 = arith.constant 0 : index
    %114 = vector.load %arg3[%c2_73, %c0_74, %c0_75] : memref<4x16x64xbf16, #tpu.memory_space<vmem>>, vector<1x16x64xbf16>
    %115 = vector.shape_cast %114 : vector<1x16x64xbf16> to vector<16x64xbf16>
    %cst_76 = arith.constant dense<0.000000e+00> : vector<8x64xf32>
    %116 = tpu.matmul %113, %115, %cst_76 {dimension_numbers = #tpu.dot_dimension_numbers<[1], [0], [0], [1], [0, 0, 1, 1], [], []>} : vector<8x16xbf16>, vector<16x64xbf16>, vector<8x64xf32> -> vector<8x64xf32>
    %c2_77 = arith.constant 2 : index
    %c0_78 = arith.constant 0 : index
    %c0_79 = arith.constant 0 : index
    %117 = vector.load %arg4[%c2_77, %c0_78, %c0_79] : memref<4x1x64xf32, #tpu.memory_space<vmem>>, vector<1x1x64xf32>
    %118 = vector.shape_cast %117 : vector<1x1x64xf32> to vector<1x64xf32>
    %119 = vector.broadcast %118 : vector<1x64xf32> to vector<8x64xf32>
    %120 = arith.addf %116, %119 : vector<8x64xf32>
    %cst_80 = arith.constant 0.000000e+00 : f32
    %121 = vector.broadcast %cst_80 : f32 to vector<8x64xf32>
    %122 = arith.maximumf %120, %121 : vector<8x64xf32>
    %123 = arith.truncf %122 : vector<8x64xf32> to vector<8x64xbf16>
    %c2_81 = arith.constant 2 : index
    %c0_82 = arith.constant 0 : index
    %c0_83 = arith.constant 0 : index
    %124 = vector.load %arg5[%c2_81, %c0_82, %c0_83] : memref<4x64x64xbf16, #tpu.memory_space<vmem>>, vector<1x64x64xbf16>
    %125 = vector.shape_cast %124 : vector<1x64x64xbf16> to vector<64x64xbf16>
    %cst_84 = arith.constant dense<0.000000e+00> : vector<8x64xf32>
    %126 = tpu.matmul %123, %125, %cst_84 {dimension_numbers = #tpu.dot_dimension_numbers<[1], [0], [0], [1], [0, 0, 1, 1], [], []>} : vector<8x64xbf16>, vector<64x64xbf16>, vector<8x64xf32> -> vector<8x64xf32>
    %c2_85 = arith.constant 2 : index
    %c0_86 = arith.constant 0 : index
    %c0_87 = arith.constant 0 : index
    %127 = vector.load %arg6[%c2_85, %c0_86, %c0_87] : memref<4x1x64xf32, #tpu.memory_space<vmem>>, vector<1x1x64xf32>
    %128 = vector.shape_cast %127 : vector<1x1x64xf32> to vector<1x64xf32>
    %129 = vector.broadcast %128 : vector<1x64xf32> to vector<8x64xf32>
    %130 = arith.addf %126, %129 : vector<8x64xf32>
    %cst_88 = arith.constant 0.000000e+00 : f32
    %131 = vector.broadcast %cst_88 : f32 to vector<8x64xf32>
    %132 = arith.maximumf %130, %131 : vector<8x64xf32>
    %133 = arith.truncf %132 : vector<8x64xf32> to vector<8x64xbf16>
    %c2_89 = arith.constant 2 : index
    %c0_90 = arith.constant 0 : index
    %c0_91 = arith.constant 0 : index
    %134 = vector.load %arg7[%c2_89, %c0_90, %c0_91] : memref<4x64x16xbf16, #tpu.memory_space<vmem>>, vector<1x64x16xbf16>
    %135 = vector.shape_cast %134 : vector<1x64x16xbf16> to vector<64x16xbf16>
    %cst_92 = arith.constant dense<0.000000e+00> : vector<8x16xf32>
    %136 = tpu.matmul %133, %135, %cst_92 {dimension_numbers = #tpu.dot_dimension_numbers<[1], [0], [0], [1], [0, 0, 1, 1], [], []>} : vector<8x64xbf16>, vector<64x16xbf16>, vector<8x16xf32> -> vector<8x16xf32>
    %c2_93 = arith.constant 2 : index
    %c0_94 = arith.constant 0 : index
    %c0_95 = arith.constant 0 : index
    %137 = vector.load %arg8[%c2_93, %c0_94, %c0_95] : memref<4x1x16xf32, #tpu.memory_space<vmem>>, vector<1x1x16xf32>
    %138 = vector.shape_cast %137 : vector<1x1x16xf32> to vector<1x16xf32>
    %139 = vector.broadcast %138 : vector<1x16xf32> to vector<8x16xf32>
    %140 = arith.addf %136, %139 : vector<8x16xf32>
    %c2_96 = arith.constant 2 : index
    %c0_97 = arith.constant 0 : index
    %c0_98 = arith.constant 0 : index
    %141 = vector.load %arg9[%c2_96, %c0_97, %c0_98] : memref<4x64x16xbf16, #tpu.memory_space<vmem>>, vector<1x64x16xbf16>
    %142 = vector.shape_cast %141 : vector<1x64x16xbf16> to vector<64x16xbf16>
    %cst_99 = arith.constant dense<0.000000e+00> : vector<8x16xf32>
    %143 = tpu.matmul %133, %142, %cst_99 {dimension_numbers = #tpu.dot_dimension_numbers<[1], [0], [0], [1], [0, 0, 1, 1], [], []>} : vector<8x64xbf16>, vector<64x16xbf16>, vector<8x16xf32> -> vector<8x16xf32>
    %c2_100 = arith.constant 2 : index
    %c0_101 = arith.constant 0 : index
    %c0_102 = arith.constant 0 : index
    %144 = vector.load %arg10[%c2_100, %c0_101, %c0_102] : memref<4x1x16xf32, #tpu.memory_space<vmem>>, vector<1x1x16xf32>
    %145 = vector.shape_cast %144 : vector<1x1x16xf32> to vector<1x16xf32>
    %146 = vector.broadcast %145 : vector<1x16xf32> to vector<8x16xf32>
    %147 = arith.addf %143, %146 : vector<8x16xf32>
    %148 = arith.mulf %101, %109 : vector<8x16xf32>
    %149 = math.exp %140 : vector<8x16xf32>
    %150 = arith.mulf %101, %149 : vector<8x16xf32>
    %151 = arith.addf %150, %147 : vector<8x16xf32>
    %152 = arith.mulf %111, %151 : vector<8x16xf32>
    %153 = arith.addf %148, %152 : vector<8x16xf32>
    %154 = arith.mulf %111, %140 : vector<8x16xf32>
    %cst_103 = arith.constant dense<0.000000e+00> : vector<8xf32>
    %155 = vector.multi_reduction <add>, %154, %cst_103 [1] : vector<8x16xf32> to vector<8xf32>
    %156 = vector.shape_cast %155 : vector<8xf32> to vector<8x1xf32>
    %157 = arith.addf %105, %156 : vector<8x1xf32>
    %c3 = arith.constant 3 : index
    %c0_104 = arith.constant 0 : index
    %c0_105 = arith.constant 0 : index
    %158 = vector.load %arg2[%c3, %c0_104, %c0_105] : memref<4x1x16xf32, #tpu.memory_space<vmem>>, vector<1x1x16xf32>
    %159 = vector.shape_cast %158 : vector<1x1x16xf32> to vector<1x16xf32>
    %160 = vector.shape_cast %159 : vector<1x16xf32> to vector<1x16xf32>
    %161 = vector.broadcast %160 : vector<1x16xf32> to vector<8x16xf32>
    %cst_106 = arith.constant 1.000000e+00 : f32
    %162 = vector.broadcast %cst_106 : f32 to vector<8x16xf32>
    %163 = arith.subf %162, %161 : vector<8x16xf32>
    %164 = arith.mulf %153, %161 : vector<8x16xf32>
    %165 = arith.truncf %164 : vector<8x16xf32> to vector<8x16xbf16>
    %c3_107 = arith.constant 3 : index
    %c0_108 = arith.constant 0 : index
    %c0_109 = arith.constant 0 : index
    %166 = vector.load %arg3[%c3_107, %c0_108, %c0_109] : memref<4x16x64xbf16, #tpu.memory_space<vmem>>, vector<1x16x64xbf16>
    %167 = vector.shape_cast %166 : vector<1x16x64xbf16> to vector<16x64xbf16>
    %cst_110 = arith.constant dense<0.000000e+00> : vector<8x64xf32>
    %168 = tpu.matmul %165, %167, %cst_110 {dimension_numbers = #tpu.dot_dimension_numbers<[1], [0], [0], [1], [0, 0, 1, 1], [], []>} : vector<8x16xbf16>, vector<16x64xbf16>, vector<8x64xf32> -> vector<8x64xf32>
    %c3_111 = arith.constant 3 : index
    %c0_112 = arith.constant 0 : index
    %c0_113 = arith.constant 0 : index
    %169 = vector.load %arg4[%c3_111, %c0_112, %c0_113] : memref<4x1x64xf32, #tpu.memory_space<vmem>>, vector<1x1x64xf32>
    %170 = vector.shape_cast %169 : vector<1x1x64xf32> to vector<1x64xf32>
    %171 = vector.broadcast %170 : vector<1x64xf32> to vector<8x64xf32>
    %172 = arith.addf %168, %171 : vector<8x64xf32>
    %cst_114 = arith.constant 0.000000e+00 : f32
    %173 = vector.broadcast %cst_114 : f32 to vector<8x64xf32>
    %174 = arith.maximumf %172, %173 : vector<8x64xf32>
    %175 = arith.truncf %174 : vector<8x64xf32> to vector<8x64xbf16>
    %c3_115 = arith.constant 3 : index
    %c0_116 = arith.constant 0 : index
    %c0_117 = arith.constant 0 : index
    %176 = vector.load %arg5[%c3_115, %c0_116, %c0_117] : memref<4x64x64xbf16, #tpu.memory_space<vmem>>, vector<1x64x64xbf16>
    %177 = vector.shape_cast %176 : vector<1x64x64xbf16> to vector<64x64xbf16>
    %cst_118 = arith.constant dense<0.000000e+00> : vector<8x64xf32>
    %178 = tpu.matmul %175, %177, %cst_118 {dimension_numbers = #tpu.dot_dimension_numbers<[1], [0], [0], [1], [0, 0, 1, 1], [], []>} : vector<8x64xbf16>, vector<64x64xbf16>, vector<8x64xf32> -> vector<8x64xf32>
    %c3_119 = arith.constant 3 : index
    %c0_120 = arith.constant 0 : index
    %c0_121 = arith.constant 0 : index
    %179 = vector.load %arg6[%c3_119, %c0_120, %c0_121] : memref<4x1x64xf32, #tpu.memory_space<vmem>>, vector<1x1x64xf32>
    %180 = vector.shape_cast %179 : vector<1x1x64xf32> to vector<1x64xf32>
    %181 = vector.broadcast %180 : vector<1x64xf32> to vector<8x64xf32>
    %182 = arith.addf %178, %181 : vector<8x64xf32>
    %cst_122 = arith.constant 0.000000e+00 : f32
    %183 = vector.broadcast %cst_122 : f32 to vector<8x64xf32>
    %184 = arith.maximumf %182, %183 : vector<8x64xf32>
    %185 = arith.truncf %184 : vector<8x64xf32> to vector<8x64xbf16>
    %c3_123 = arith.constant 3 : index
    %c0_124 = arith.constant 0 : index
    %c0_125 = arith.constant 0 : index
    %186 = vector.load %arg7[%c3_123, %c0_124, %c0_125] : memref<4x64x16xbf16, #tpu.memory_space<vmem>>, vector<1x64x16xbf16>
    %187 = vector.shape_cast %186 : vector<1x64x16xbf16> to vector<64x16xbf16>
    %cst_126 = arith.constant dense<0.000000e+00> : vector<8x16xf32>
    %188 = tpu.matmul %185, %187, %cst_126 {dimension_numbers = #tpu.dot_dimension_numbers<[1], [0], [0], [1], [0, 0, 1, 1], [], []>} : vector<8x64xbf16>, vector<64x16xbf16>, vector<8x16xf32> -> vector<8x16xf32>
    %c3_127 = arith.constant 3 : index
    %c0_128 = arith.constant 0 : index
    %c0_129 = arith.constant 0 : index
    %189 = vector.load %arg8[%c3_127, %c0_128, %c0_129] : memref<4x1x16xf32, #tpu.memory_space<vmem>>, vector<1x1x16xf32>
    %190 = vector.shape_cast %189 : vector<1x1x16xf32> to vector<1x16xf32>
    %191 = vector.broadcast %190 : vector<1x16xf32> to vector<8x16xf32>
    %192 = arith.addf %188, %191 : vector<8x16xf32>
    %c3_130 = arith.constant 3 : index
    %c0_131 = arith.constant 0 : index
    %c0_132 = arith.constant 0 : index
    %193 = vector.load %arg9[%c3_130, %c0_131, %c0_132] : memref<4x64x16xbf16, #tpu.memory_space<vmem>>, vector<1x64x16xbf16>
    %194 = vector.shape_cast %193 : vector<1x64x16xbf16> to vector<64x16xbf16>
    %cst_133 = arith.constant dense<0.000000e+00> : vector<8x16xf32>
    %195 = tpu.matmul %185, %194, %cst_133 {dimension_numbers = #tpu.dot_dimension_numbers<[1], [0], [0], [1], [0, 0, 1, 1], [], []>} : vector<8x64xbf16>, vector<64x16xbf16>, vector<8x16xf32> -> vector<8x16xf32>
    %c3_134 = arith.constant 3 : index
    %c0_135 = arith.constant 0 : index
    %c0_136 = arith.constant 0 : index
    %196 = vector.load %arg10[%c3_134, %c0_135, %c0_136] : memref<4x1x16xf32, #tpu.memory_space<vmem>>, vector<1x1x16xf32>
    %197 = vector.shape_cast %196 : vector<1x1x16xf32> to vector<1x16xf32>
    %198 = vector.broadcast %197 : vector<1x16xf32> to vector<8x16xf32>
    %199 = arith.addf %195, %198 : vector<8x16xf32>
    %200 = arith.mulf %153, %161 : vector<8x16xf32>
    %201 = math.exp %192 : vector<8x16xf32>
    %202 = arith.mulf %153, %201 : vector<8x16xf32>
    %203 = arith.addf %202, %199 : vector<8x16xf32>
    %204 = arith.mulf %163, %203 : vector<8x16xf32>
    %205 = arith.addf %200, %204 : vector<8x16xf32>
    %206 = arith.mulf %163, %192 : vector<8x16xf32>
    %cst_137 = arith.constant dense<0.000000e+00> : vector<8xf32>
    %207 = vector.multi_reduction <add>, %206, %cst_137 [1] : vector<8x16xf32> to vector<8xf32>
    %208 = vector.shape_cast %207 : vector<8xf32> to vector<8x1xf32>
    %209 = arith.addf %157, %208 : vector<8x1xf32>
    %c0_138 = arith.constant 0 : index
    %c0_139 = arith.constant 0 : index
    %210 = vector.load %arg11[%c0_138, %c0_139] : memref<8x16xf32, #tpu.memory_space<vmem>>, vector<8x16xf32>
    tpu.vector_store %arg11[%c0_138, %c0_139], %205 {strides = array<i32>} : memref<8x16xf32, #tpu.memory_space<vmem>>, vector<8x16xf32>,
    %c0_140 = arith.constant 0 : index
    %c0_141 = arith.constant 0 : index
    %211 = vector.load %arg12[%c0_140, %c0_141] : memref<8x1xf32, #tpu.memory_space<vmem>>, vector<8x1xf32>
    tpu.vector_store %arg12[%c0_140, %c0_141], %209 {strides = array<i32>} : memref<8x1xf32, #tpu.memory_space<vmem>>, vector<8x1xf32>,
    return
  }
  func.func @transform_0(%arg0: i32) -> (i32, i32) {
    %c0_i32 = arith.constant 0 : i32
    %c0_i32_0 = arith.constant 0 : i32
    return %arg0, %c0_i32 : i32, i32
  }
  func.func @transform_1(%arg0: i32) -> (i32, i32, i32) {
    %c0_i32 = arith.constant 0 : i32
    %c0_i32_0 = arith.constant 0 : i32
    %c0_i32_1 = arith.constant 0 : i32
    %c0_i32_2 = arith.constant 0 : i32
    return %c0_i32, %c0_i32_0, %c0_i32_1 : i32, i32, i32
  }
  func.func @transform_2(%arg0: i32) -> (i32, i32, i32) {
    %c0_i32 = arith.constant 0 : i32
    %c0_i32_0 = arith.constant 0 : i32
    %c0_i32_1 = arith.constant 0 : i32
    %c0_i32_2 = arith.constant 0 : i32
    return %c0_i32, %c0_i32_0, %c0_i32_1 : i32, i32, i32
  }
  func.func @transform_3(%arg0: i32) -> (i32, i32, i32) {
    %c0_i32 = arith.constant 0 : i32
    %c0_i32_0 = arith.constant 0 : i32
    %c0_i32_1 = arith.constant 0 : i32
    %c0_i32_2 = arith.constant 0 : i32
    return %c0_i32, %c0_i32_0, %c0_i32_1 : i32, i32, i32
  }
  func.func @transform_4(%arg0: i32) -> (i32, i32, i32) {
    %c0_i32 = arith.constant 0 : i32
    %c0_i32_0 = arith.constant 0 : i32
    %c0_i32_1 = arith.constant 0 : i32
    %c0_i32_2 = arith.constant 0 : i32
    return %c0_i32, %c0_i32_0, %c0_i32_1 : i32, i32, i32
  }
  func.func @transform_5(%arg0: i32) -> (i32, i32, i32) {
    %c0_i32 = arith.constant 0 : i32
    %c0_i32_0 = arith.constant 0 : i32
    %c0_i32_1 = arith.constant 0 : i32
    %c0_i32_2 = arith.constant 0 : i32
    return %c0_i32, %c0_i32_0, %c0_i32_1 : i32, i32, i32
  }
  func.func @transform_6(%arg0: i32) -> (i32, i32, i32) {
    %c0_i32 = arith.constant 0 : i32
    %c0_i32_0 = arith.constant 0 : i32
    %c0_i32_1 = arith.constant 0 : i32
    %c0_i32_2 = arith.constant 0 : i32
    return %c0_i32, %c0_i32_0, %c0_i32_1 : i32, i32, i32
  }
  func.func @transform_7(%arg0: i32) -> (i32, i32, i32) {
    %c0_i32 = arith.constant 0 : i32
    %c0_i32_0 = arith.constant 0 : i32
    %c0_i32_1 = arith.constant 0 : i32
    %c0_i32_2 = arith.constant 0 : i32
    return %c0_i32, %c0_i32_0, %c0_i32_1 : i32, i32, i32
  }
  func.func @transform_8(%arg0: i32) -> (i32, i32, i32) {
    %c0_i32 = arith.constant 0 : i32
    %c0_i32_0 = arith.constant 0 : i32
    %c0_i32_1 = arith.constant 0 : i32
    %c0_i32_2 = arith.constant 0 : i32
    return %c0_i32, %c0_i32_0, %c0_i32_1 : i32, i32, i32
  }
  func.func @transform_9(%arg0: i32) -> (i32, i32, i32) {
    %c0_i32 = arith.constant 0 : i32
    %c0_i32_0 = arith.constant 0 : i32
    %c0_i32_1 = arith.constant 0 : i32
    %c0_i32_2 = arith.constant 0 : i32
    return %c0_i32, %c0_i32_0, %c0_i32_1 : i32, i32, i32
  }
  func.func @transform_10(%arg0: i32) -> (i32, i32) {
    %c0_i32 = arith.constant 0 : i32
    %c0_i32_0 = arith.constant 0 : i32
    return %arg0, %c0_i32 : i32, i32
  }
  func.func @transform_11(%arg0: i32) -> (i32, i32) {
    %c0_i32 = arith.constant 0 : i32
    %c0_i32_0 = arith.constant 0 : i32
    return %arg0, %c0_i32 : i32, i32
  }
}

</mosaic_0001>

<bundles_post_ra>
// kernel: realnvp_forward.1
= control target key start
LH: loop header
LB: loop body
LE: loop exit
PB: predicated region body
PF: predicated region fallthrough
CT: control target
= control target key end

     0   :  { %vm59_vm0 = vcmask 130048   ;;  %s1675_s0 = inlined_call_operand.vmem [shape: f32[8,16], index: 0, kind: input, shape index: {}]   ;;  %s1676_s1 = inlined_call_operand.vmem [shape: f32[4,1,16], index: 1, kind: input, shape index: {}]   ;;  %s1677_s2 = inlined_call_operand.vmem [shape: bf16[4,16,64], index: 2, kind: input, shape index: {}]   ;;  %s1678_s3 = inlined_call_operand.vmem [shape: f32[4,1,64], index: 3, kind: input, shape index: {}]   ;;  %s1679_s4 = inlined_call_operand.vmem [shape: bf16[4,64,64], index: 4, kind: input, shape index: {}]   ;;  %s1680_s5 = inlined_call_operand.vmem [shape: f32[4,1,64], index: 5, kind: input, shape index: {}]   ;;  %s1681_s6 = inlined_call_operand.vmem [shape: bf16[4,64,16], index: 6, kind: input, shape index: {}]   ;;  %s1682_s7 = inlined_call_operand.vmem [shape: f32[4,1,16], index: 7, kind: input, shape index: {}]   ;;  %s1683_s8 = inlined_call_operand.vmem [shape: bf16[4,64,16], index: 8, kind: input, shape index: {}]   ;;  %s1684_s9 = inlined_call_operand.vmem [shape: f32[4,1,16], index: 9, kind: input, shape index: {}]   ;;  %s1685_s10 = inlined_call_operand.hbm [shape: f32[8,16], index: 10, kind: output, shape index: {0}]   ;;  %s1686_s11 = inlined_call_operand.vmem [shape: f32[8,1], index: 11, kind: output, shape index: {1}]  }
   0x1   :  { %v1221_v0 = vld [vmem:[%s1677_s2] sm:$0xff]  ;;  %v1225_v3 = vld [vmem:[%s1679_s4 + $0x18] sm:$0xff]  ;;  %v1224_v4 = vld [vmem:[%s1679_s4 + $0x10] sm:$0xff] }
   0x2   :  { %v1395_v1 = vld [vmem:[%s1675_s0] sm:$0xff]  ;;  %70 = vmatpush.bf16.msra.mxu0 %v1221_v0  ;;  %122 = vmatpush.bf16.msra.mxu1 %v1225_v3 }
   0x3   :  { %v1400_v2 = vld [vmem:[%s1676_s1] ss:$0 sm:$0xff] }
   0x4   :  { %v1410_v5 = vmul.f32 %v1400_v2, %v1395_v1 }
   0x6   :  { %v46_v6 = vpack.c.bf16 %v1410_v5, %v1410_v5  ;;  %123 = vmatpush.bf16.msra.mxu1 %v1224_v4 }
   0x8   :  { %908 = vmatmul.msk.bf16.vlgmr.msra.gmra.mxu0 %vm59_vm0, %v46_v6 }
   0x9   :  { %17 = vsyncpa [#allocation3], 0  ;;  %v1223_v7 = vld [vmem:[%s1679_s4 + $0x8] sm:$0xff]  ;;  %v1222_v8 = vld [vmem:[%s1679_s4] sm:$0xff]  ;;  %vm114_vm1 = vcmask 523264   ;;  %v44_v31 = vsub.f32 1.0, %v1400_v2 }
   0xa   :  { %124 = vmatpush.bf16.msra.mxu1 %v1223_v7  ;;  %v1229_v9 = vld [vmem:[%s1681_s6 + $0x18] sm:$0xff]  ;;  %v1228_v11 = vld [vmem:[%s1681_s6 + $0x10] sm:$0xff]  ;;  %v1275_v13 = vld [vmem:[%s1678_s3] ss:$0 sm:$0xff]  ;;  %s891_s17 = sshll.u32 %s1685_s10, 4  ;;  %vm882_vm2 = vcmask 7168   ;;  %s892_s17 = int_to_ptr.hbm [resolvable:$true] %s891_s17 }
   0xb   :  { %v1233_v10 = vld [vmem:[%s1683_s8 + $0x18] sm:$0xff]  ;;  %176 = vmatpush.bf16.msra.mxu2 %v1229_v9  ;;  %v1232_v12 = vld [vmem:[%s1683_s8 + $0x10] sm:$0xff]  ;;  %v1227_v19 = vld [vmem:[%s1681_s6 + $0x8] sm:$0xff] }
   0xc   :  { %225 = vmatpush.bf16.msra.mxu3 %v1233_v10  ;;  %v1231_v20 = vld [vmem:[%s1683_s8 + $0x8] sm:$0xff]  ;;  %v1226_v21 = vld [vmem:[%s1681_s6] sm:$0xff]  ;;  %v1238_v50 = vld [vmem:[%s1679_s4 + $0x38] sm:$0xff] }
   0xd   :  { %v1230_v22 = vld [vmem:[%s1683_s8] sm:$0xff]  ;;  %v1234_v29 = vld [vmem:[%s1677_s2 + $0x8] sm:$0xff]  ;;  %v1237_v51 = vld [vmem:[%s1679_s4 + $0x30] sm:$0xff] }
   0xe   :  { %125 = vmatpush.bf16.msra.mxu1 %v1222_v8  ;;  %v1276_v23 = vld [vmem:[%s1680_s5] ss:$0 sm:$0xff]  ;;  %277 = vmatpush.bf16.msrb.mxu0 %v1234_v29  ;;  %v1469_v46 = vld [vmem:[%s1676_s1 + $0x1] ss:$0 sm:$0xff]  ;;  %v1236_v52 = vld [vmem:[%s1679_s4 + $0x28] sm:$0xff] }
   0xf   :  { %177 = vmatpush.bf16.msra.mxu2 %v1228_v11  ;;  %v1277_v30 = vld [vmem:[%s1682_s7] ss:$0 sm:$0xff]  ;;  %v1242_v54 = vld [vmem:[%s1681_s6 + $0x38] sm:$0xff]  ;;  %v1241_v56 = vld [vmem:[%s1681_s6 + $0x30] sm:$0xff] }
  0x10   :  { %226 = vmatpush.bf16.msra.mxu3 %v1232_v12  ;;  %v1278_v38 = vld [vmem:[%s1684_s9] ss:$0 sm:$0xff]  ;;  %v1246_v55 = vld [vmem:[%s1683_s8 + $0x38] sm:$0xff]  ;;  %v1245_v57 = vld [vmem:[%s1683_s8 + $0x30] sm:$0xff]  ;;  %v250_v12 = vsub.f32 1.0, %v1469_v46 }
  0x11   :  { %v1235_v53 = vld [vmem:[%s1679_s4 + $0x20] sm:$0xff]  ;;  %v1240_v58 = vld [vmem:[%s1681_s6 + $0x28] sm:$0xff]  ;;  %v1247_v10 = vld [vmem:[%s1677_s2 + $0x10] sm:$0xff] }
  0x12   :  { %330 = vmatpush.bf16.msrb.mxu1 %v1238_v50  ;;  %v1280_v59 = vld [vmem:[%s1678_s3 + $0x1] ss:$0 sm:$0xff]  ;;  %489 = vmatpush.bf16.msra.mxu0 %v1247_v10 }
  0x13   :  { %178 = vmatpush.bf16.msra.mxu2 %v1227_v19  ;;  %v1239_v2 = vld [vmem:[%s1681_s6 + $0x20] sm:$0xff] }
  0x14   :  { %227 = vmatpush.bf16.msra.mxu3 %v1231_v20  ;;  %v1243_v3 = vld [vmem:[%s1683_s8 + $0x20] sm:$0xff] }
  0x15   :  { %v1281_v4 = vld [vmem:[%s1680_s5 + $0x1] ss:$0 sm:$0xff] }
  0x16   :  { %331 = vmatpush.bf16.msrb.mxu1 %v1237_v51  ;;  %v1282_v11 = vld [vmem:[%s1682_s7 + $0x1] ss:$0 sm:$0xff] }
  0x17   :  { %179 = vmatpush.bf16.msra.mxu2 %v1226_v21  ;;  %v1283_v19 = vld [vmem:[%s1684_s9 + $0x1] ss:$0 sm:$0xff] }
  0x18   :  { %228 = vmatpush.bf16.msra.mxu3 %v1230_v22 }
  0x1a   :  { %332 = vmatpush.bf16.msrb.mxu1 %v1236_v52 }
  0x1b   :  { %386 = vmatpush.bf16.msrb.mxu2 %v1242_v54 }
  0x1c   :  { %437 = vmatpush.bf16.msrb.mxu3 %v1246_v55  ;;  %v1260_v55 = vld [vmem:[%s1677_s2 + $0x18] sm:$0xff] }
  0x1e   :  { %333 = vmatpush.bf16.msrb.mxu1 %v1235_v53 }
  0x1f   :  { %387 = vmatpush.bf16.msrb.mxu2 %v1241_v56  ;;  %v1287_v56 = vld [vmem:[%s1682_s7 + $0x2] ss:$0 sm:$0xff] }
  0x20   :  { %438 = vmatpush.bf16.msrb.mxu3 %v1245_v57 }
  0x23   :  { %388 = vmatpush.bf16.msrb.mxu2 %v1240_v58 }
  0x27   :  { %389 = vmatpush.bf16.msrb.mxu2 %v1239_v2 }
  0x85   :  { %v72_v14 = vpop.f32.mrf.mxu0 }
  0x86   :  { %v73_v15 = vadd.f32 %v1275_v13, %v72_v14 }
  0x88   :  { %v76_v16 = vmax.f32 %v73_v15, 0.0 }
  0x8a   :  { %v77_v17 = vpack.c.bf16 %v76_v16, %v76_v16 }
  0x8c   :  { %925 = vmatmul.msk.bf16.vlgmr.msra.gmra.mxu1 %vm114_vm1, %v77_v17 }
  0x8d   :  { %v74_v18 = vpop.f32.mrf.mxu0 }
 0x109   :  { %v127_v24 = vpop.f32.mrf.mxu1 }
 0x10a   :  { %v128_v25 = vadd.f32 %v1276_v23, %v127_v24 }
 0x10c   :  { %v131_v26 = vmax.f32 %v128_v25, 0.0 }
 0x10e   :  { %v132_v27 = vpack.c.bf16 %v131_v26, %v131_v26 }
 0x110   :  { %942 = vmatmul.msk.bf16.vlgmr.msra.gmra.mxu2 %vm114_vm1, %v132_v27  ;;  %959 = vmatmul.msk.bf16.vlgmr.msra.gmra.mxu3 %vm114_vm1, %v132_v27  ;;  %v1537_v27 = vld [vmem:[%s1676_s1 + $0x2] ss:$0 sm:$0xff] }
 0x111   :  { %v129_v28 = vpop.f32.mrf.mxu1  ;;  %v462_v57 = vsub.f32 1.0, %v1537_v27 }
 0x193   :  { %v181_v32 = vpop.f32.mrf.mxu2  ;;  %v230_v33 = vpop.f32.mrf.mxu3 }
 0x194   :  { %v182_v34 = vadd.f32 %v1277_v30, %v181_v32  ;;  %v231_v42 = vadd.f32 %v1278_v38, %v230_v33  ;;  %v1250_v32 = vld [vmem:[%s1679_s4 + $0x50] sm:$0xff]  ;;  %v1249_v33 = vld [vmem:[%s1679_s4 + $0x48] sm:$0xff] }
 0x195   :  { %v1258_v38 = vld [vmem:[%s1683_s8 + $0x50] sm:$0xff] }
 0x196   :  { %v234_v35 = vmul.f32 1.442695, %v182_v34  ;;  %v240_v36 = vmul.f32 %v182_v34, %v44_v31  ;;  %v1248_v34 = vld [vmem:[%s1679_s4 + $0x40] sm:$0xff] }
 0x198   :  { %1294 = vpow2.f32 %v234_v35  ;;  %v241_v37 = vsel %vm59_vm0, %v240_v36, 0.0  ;;  %v1255_v35 = vld [vmem:[%s1681_s6 + $0x58] sm:$0xff] }
 0x199   :  { %242 = vadd.xlane.f32.xlu0 %v241_v37  ;;  %v1259_v36 = vld [vmem:[%s1683_s8 + $0x58] sm:$0xff]  ;;  %598 = vmatpush.bf16.msra.mxu2 %v1255_v35  ;;  %v1254_v37 = vld [vmem:[%s1681_s6 + $0x50] sm:$0xff] }
 0x19b   :  { %v183_v39 = vpop.f32.mrf.mxu2  ;;  %v232_v40 = vpop.f32.mrf.mxu3 }
 0x19c   :  { %v1253_v39 = vld [vmem:[%s1681_s6 + $0x48] sm:$0xff]  ;;  %v1285_v40 = vld [vmem:[%s1678_s3 + $0x2] ss:$0 sm:$0xff] }
 0x19d   :  { %599 = vmatpush.bf16.msra.mxu2 %v1254_v37 }
 0x19e   :  { %v1295_v41 = vpop.eup %1294 }
 0x19f   :  { %v236_v43 = vmul.f32 %v1295_v41, %v1395_v1  ;;  %v1244_v1 = vld [vmem:[%s1683_s8 + $0x28] sm:$0xff] }
 0x1a0   :  { %439 = vmatpush.bf16.msrb.mxu3 %v1244_v1 }
 0x1a1   :  { %v237_v44 = vadd.f32 %v236_v43, %v231_v42  ;;  %600 = vmatpush.bf16.msra.mxu2 %v1253_v39 }
 0x1a3   :  { %v238_v45 = vmul.f32 %v237_v44, %v44_v31  ;;  %v1251_v31 = vld [vmem:[%s1679_s4 + $0x58] sm:$0xff] }
 0x1a4   :  { %440 = vmatpush.bf16.msrb.mxu3 %v1243_v3  ;;  %542 = vmatpush.bf16.msra.mxu1 %v1251_v31 }
 0x1a5   :  { %v239_v47 = vadd.f32 %v238_v45, %v1410_v5 }
 0x1a7   :  { %v1473_v48 = vmul.f32 %v1469_v46, %v239_v47  ;;  %v1257_v46 = vld [vmem:[%s1683_s8 + $0x48] sm:$0xff] }
 0x1a8   :  { %543 = vmatpush.bf16.msra.mxu1 %v1250_v32  ;;  %649 = vmatpush.bf16.msra.mxu3 %v1259_v36  ;;  %v1292_v36 = vld [vmem:[%s1682_s7 + $0x3] ss:$0 sm:$0xff]  ;;  %s1328_s7 = smov [#allocation2]  }
 0x1a9   :  { %v252_v49 = vpack.c.bf16 %v1473_v48, %v1473_v48  ;;  %s889_s14 = sshll.u32 %s1328_s7, 4  ;;  %s890_s14 = int_to_ptr.vmem [resolvable:$true] %s889_s14 }
 0x1ab   :  { %968 = vmatmul.msk.bf16.vlgmr.msrb.gmra.mxu0 %vm59_vm0, %v252_v49  ;;  %v1286_v49 = vld [vmem:[%s1680_s5 + $0x2] ss:$0 sm:$0xff] }
 0x1ac   :  { %544 = vmatpush.bf16.msra.mxu1 %v1249_v33  ;;  %650 = vmatpush.bf16.msra.mxu3 %v1258_v38 }
 0x1ad   :  { %701 = vmatpush.bf16.msrb.mxu0 %v1260_v55 }
 0x1b0   :  { %545 = vmatpush.bf16.msra.mxu1 %v1248_v34  ;;  %651 = vmatpush.bf16.msra.mxu3 %v1257_v46 }
 0x228   :  { %v279_v60 = vpop.f32.mrf.mxu0 }
 0x229   :  { %v280_v61 = vadd.f32 %v1280_v59, %v279_v60 }
 0x22b   :  { %v283_v62 = vmax.f32 %v280_v61, 0.0 }
 0x22d   :  { %v284_v63 = vpack.c.bf16 %v283_v62, %v283_v62 }
 0x22f   :  { %994 = vmatmul.msk.bf16.vlgmr.msrb.gmra.mxu1 %vm114_vm1, %v284_v63 }
 0x230   :  { %v281_v0 = vpop.f32.mrf.mxu0 }
 0x231   :  { %v1288_v0 = vld [vmem:[%s1684_s9 + $0x2] ss:$0 sm:$0xff] }
 0x2ac   :  { %v335_v5 = vpop.f32.mrf.mxu1 }
 0x2ad   :  { %v336_v6 = vadd.f32 %v1281_v4, %v335_v5 }
 0x2af   :  { %v339_v7 = vmax.f32 %v336_v6, 0.0 }
 0x2b1   :  { %v340_v8 = vpack.c.bf16 %v339_v7, %v339_v7  ;;  %v1605_v7 = vld [vmem:[%s1676_s1 + $0x3] ss:$0 sm:$0xff] }
 0x2b2   :  { %v674_v37 = vsub.f32 1.0, %v1605_v7 }
 0x2b3   :  { %1020 = vmatmul.msk.bf16.vlgmr.msrb.gmra.mxu2 %vm114_vm1, %v340_v8  ;;  %1046 = vmatmul.msk.bf16.vlgmr.msrb.gmra.mxu3 %vm114_vm1, %v340_v8 }
 0x2b4   :  { %v337_v9 = vpop.f32.mrf.mxu1 }
 0x336   :  { %v391_v13 = vpop.f32.mrf.mxu2  ;;  %v442_v14 = vpop.f32.mrf.mxu3 }
 0x337   :  { %v392_v15 = vadd.f32 %v1282_v11, %v391_v13  ;;  %v443_v23 = vadd.f32 %v1283_v19, %v442_v14  ;;  %v1263_v13 = vld [vmem:[%s1679_s4 + $0x70] sm:$0xff]  ;;  %v1262_v14 = vld [vmem:[%s1679_s4 + $0x68] sm:$0xff] }
 0x338   :  { %v1271_v19 = vld [vmem:[%s1683_s8 + $0x70] sm:$0xff] }
 0x339   :  { %v446_v16 = vmul.f32 1.442695, %v392_v15  ;;  %v452_v17 = vmul.f32 %v392_v15, %v250_v12  ;;  %v1261_v15 = vld [vmem:[%s1679_s4 + $0x60] sm:$0xff] }
 0x33b   :  { %1296 = vpow2.f32 %v446_v16  ;;  %v453_v18 = vsel %vm59_vm0, %v452_v17, 0.0  ;;  %v1268_v16 = vld [vmem:[%s1681_s6 + $0x78] sm:$0xff] }
 0x33c   :  { %454 = vadd.xlane.f32.xlu0 %v453_v18  ;;  %v1272_v17 = vld [vmem:[%s1683_s8 + $0x78] sm:$0xff]  ;;  %v1267_v18 = vld [vmem:[%s1681_s6 + $0x70] sm:$0xff] }
 0x33e   :  { %v393_v20 = vpop.f32.mrf.mxu2  ;;  %v444_v21 = vpop.f32.mrf.mxu3 }
 0x33f   :  { %v1266_v20 = vld [vmem:[%s1681_s6 + $0x68] sm:$0xff]  ;;  %v1290_v21 = vld [vmem:[%s1678_s3 + $0x3] ss:$0 sm:$0xff] }
 0x341   :  { %v1297_v22 = vpop.eup %1296 }
 0x342   :  { %v448_v24 = vmul.f32 %v1297_v22, %v239_v47  ;;  %v1252_v47 = vld [vmem:[%s1681_s6 + $0x40] sm:$0xff] }
 0x343   :  { %601 = vmatpush.bf16.msra.mxu2 %v1252_v47 }
 0x344   :  { %v449_v25 = vadd.f32 %v448_v24, %v443_v23 }
 0x346   :  { %v450_v26 = vmul.f32 %v449_v25, %v250_v12  ;;  %v1264_v12 = vld [vmem:[%s1679_s4 + $0x78] sm:$0xff] }
 0x347   :  { %754 = vmatpush.bf16.msrb.mxu1 %v1264_v12  ;;  %810 = vmatpush.bf16.msrb.mxu2 %v1268_v16 }
 0x348   :  { %v451_v28 = vadd.f32 %v450_v26, %v1473_v48  ;;  %v1256_v48 = vld [vmem:[%s1683_s8 + $0x40] sm:$0xff] }
 0x349   :  { %652 = vmatpush.bf16.msra.mxu3 %v1256_v48 }
 0x34a   :  { %v1541_v29 = vmul.f32 %v1537_v27, %v451_v28  ;;  %v1270_v27 = vld [vmem:[%s1683_s8 + $0x68] sm:$0xff] }
 0x34b   :  { %755 = vmatpush.bf16.msrb.mxu1 %v1263_v13  ;;  %811 = vmatpush.bf16.msrb.mxu2 %v1267_v18 }
 0x34c   :  { %v464_v30 = vpack.c.bf16 %v1541_v29, %v1541_v29 }
 0x34d   :  { %861 = vmatpush.bf16.msrb.mxu3 %v1272_v17 }
 0x34e   :  { %1055 = vmatmul.msk.bf16.vlgmr.msra.gmra.mxu0 %vm59_vm0, %v464_v30  ;;  %v1291_v30 = vld [vmem:[%s1680_s5 + $0x3] ss:$0 sm:$0xff] }
 0x34f   :  { %756 = vmatpush.bf16.msrb.mxu1 %v1262_v14  ;;  %812 = vmatpush.bf16.msrb.mxu2 %v1266_v20 }
 0x351   :  { %862 = vmatpush.bf16.msrb.mxu3 %v1271_v19 }
 0x353   :  { %757 = vmatpush.bf16.msrb.mxu1 %v1261_v15 }
 0x355   :  { %863 = vmatpush.bf16.msrb.mxu3 %v1270_v27 }
 0x3cb   :  { %v491_v41 = vpop.f32.mrf.mxu0 }
 0x3cc   :  { %v492_v42 = vadd.f32 %v1285_v40, %v491_v41 }
 0x3ce   :  { %v495_v43 = vmax.f32 %v492_v42, 0.0 }
 0x3d0   :  { %v496_v44 = vpack.c.bf16 %v495_v43, %v495_v43 }
 0x3d2   :  { %1081 = vmatmul.msk.bf16.vlgmr.msra.gmra.mxu1 %vm114_vm1, %v496_v44  ;;  %v1293_v44 = vld [vmem:[%s1684_s9 + $0x3] ss:$0 sm:$0xff] }
 0x3d3   :  { %v493_v45 = vpop.f32.mrf.mxu0 }
 0x44f   :  { %v547_v50 = vpop.f32.mrf.mxu1 }
 0x450   :  { %v548_v51 = vadd.f32 %v1286_v49, %v547_v50 }
 0x452   :  { %v551_v52 = vmax.f32 %v548_v51, 0.0 }
 0x454   :  { %v552_v53 = vpack.c.bf16 %v551_v52, %v551_v52 }
 0x456   :  { %1107 = vmatmul.msk.bf16.vlgmr.msra.gmra.mxu2 %vm114_vm1, %v552_v53  ;;  %1133 = vmatmul.msk.bf16.vlgmr.msra.gmra.mxu3 %vm114_vm1, %v552_v53  ;;  %v243_v53 = vpop.xlane.xlu0 %242 }
 0x457   :  { %v549_v54 = vpop.f32.mrf.mxu1 }
 0x45e   :  { %v455_v55 = vpop.xlane.xlu0 %454 }
 0x4d9   :  { %v603_v58 = vpop.f32.mrf.mxu2  ;;  %v654_v59 = vpop.f32.mrf.mxu3 }
 0x4da   :  { %v604_v60 = vadd.f32 %v1287_v56, %v603_v58  ;;  %v655_v4 = vadd.f32 %v1288_v0, %v654_v59  ;;  %v456_v56 = vadd.f32 %v455_v55, %v243_v53 }
 0x4dc   :  { %v658_v61 = vmul.f32 1.442695, %v604_v60  ;;  %v664_v62 = vmul.f32 %v604_v60, %v462_v57 }
 0x4de   :  { %1298 = vpow2.f32 %v658_v61  ;;  %v665_v63 = vsel %vm59_vm0, %v664_v62, 0.0 }
 0x4df   :  { %666 = vadd.xlane.f32.xlu1 %v665_v63 }
 0x4e1   :  { %v605_v1 = vpop.f32.mrf.mxu2  ;;  %v656_v2 = vpop.f32.mrf.mxu3 }
 0x4e4   :  { %v1299_v3 = vpop.eup %1298 }
 0x4e5   :  { %v660_v5 = vmul.f32 %v1299_v3, %v451_v28  ;;  %v1265_v28 = vld [vmem:[%s1681_s6 + $0x60] sm:$0xff] }
 0x4e6   :  { %813 = vmatpush.bf16.msrb.mxu2 %v1265_v28 }
 0x4e7   :  { %v661_v6 = vadd.f32 %v660_v5, %v655_v4 }
 0x4e9   :  { %v662_v8 = vmul.f32 %v661_v6, %v462_v57 }
 0x4eb   :  { %v663_v9 = vadd.f32 %v662_v8, %v1541_v29  ;;  %v1269_v29 = vld [vmem:[%s1683_s8 + $0x60] sm:$0xff] }
 0x4ec   :  { %864 = vmatpush.bf16.msrb.mxu3 %v1269_v29 }
 0x4ed   :  { %v1609_v10 = vmul.f32 %v1605_v7, %v663_v9 }
 0x4ef   :  { %v676_v11 = vpack.c.bf16 %v1609_v10, %v1609_v10 }
 0x4f1   :  { %1142 = vmatmul.msk.bf16.vlgmr.msrb.gmra.mxu0 %vm59_vm0, %v676_v11 }
 0x552   :  { %v667_v54 = vpop.xlane.xlu1 %666 }
 0x553   :  { %v668_v57 = vadd.f32 %v667_v54, %v456_v56 }
 0x56e   :  { %v703_v22 = vpop.f32.mrf.mxu0 }
 0x56f   :  { %v704_v23 = vadd.f32 %v1290_v21, %v703_v22 }
 0x571   :  { %v707_v24 = vmax.f32 %v704_v23, 0.0 }
 0x573   :  { %v708_v25 = vpack.c.bf16 %v707_v24, %v707_v24 }
 0x575   :  { %1168 = vmatmul.msk.bf16.vlgmr.msrb.gmra.mxu1 %vm114_vm1, %v708_v25 }
 0x576   :  { %v705_v26 = vpop.f32.mrf.mxu0 }
 0x5f2   :  { %v759_v31 = vpop.f32.mrf.mxu1 }
 0x5f3   :  { %v760_v32 = vadd.f32 %v1291_v30, %v759_v31 }
 0x5f5   :  { %v763_v33 = vmax.f32 %v760_v32, 0.0 }
 0x5f7   :  { %v764_v34 = vpack.c.bf16 %v763_v33, %v763_v33 }
 0x5f9   :  { %1194 = vmatmul.msk.bf16.vlgmr.msrb.gmra.mxu2 %vm114_vm1, %v764_v34  ;;  %1220 = vmatmul.msk.bf16.vlgmr.msrb.gmra.mxu3 %vm114_vm1, %v764_v34 }
 0x5fa   :  { %v761_v35 = vpop.f32.mrf.mxu1 }
 0x67c   :  { %v815_v38 = vpop.f32.mrf.mxu2  ;;  %v866_v39 = vpop.f32.mrf.mxu3 }
 0x67d   :  { %v816_v40 = vadd.f32 %v1292_v36, %v815_v38  ;;  %v867_v48 = vadd.f32 %v1293_v44, %v866_v39 }
 0x67f   :  { %v870_v41 = vmul.f32 1.442695, %v816_v40  ;;  %v876_v42 = vmul.f32 %v816_v40, %v674_v37 }
 0x681   :  { %1300 = vpow2.f32 %v870_v41  ;;  %v877_v43 = vsel %vm59_vm0, %v876_v42, 0.0 }
 0x682   :  { %878 = vadd.xlane.f32.xlu1 %v877_v43 }
 0x684   :  { %v817_v45 = vpop.f32.mrf.mxu2  ;;  %v868_v46 = vpop.f32.mrf.mxu3 }
 0x687   :  { %v1301_v47 = vpop.eup %1300 }
 0x688   :  { %v872_v49 = vmul.f32 %v1301_v47, %v663_v9 }
 0x68a   :  { %v873_v50 = vadd.f32 %v872_v49, %v867_v48 }
 0x68c   :  { %v874_v51 = vmul.f32 %v873_v50, %v674_v37 }
 0x68e   :  { %v875_v52 = vadd.f32 %v874_v51, %v1609_v10 }
 0x690   :  { %881 = vst.msk [vmem:[#allocation2] sm:$0xff] %vm59_vm0, %v875_v52 }
 0x691   :  { %894 = dma.vmem_to_hbm [thread:$0]  %s890_s14, 128, %s892_s17, [#allocation3]  }
 0x6f5   :  { %v879_v58 = vpop.xlane.xlu1 %878 }
 0x6f6   :  { %v880_v59 = vadd.f32 %v879_v58, %v668_v57 }
 0x6f8   :  { %883 = vst.msk [vmem:[%s1686_s11] sm:$0xff] %vm882_vm2, %v880_v59 }
 0x6f9   :  { %1326 = dma.done.wait [#allocation3], 128  }
 0x6fa   :  { %1327 = vsyncadd [#allocation3], 4294967168 }
 0x6fb   :  { %903 = vsyncpa [#allocation3], 1 }

</bundles_post_ra>
